<compile_context>
chip_gen: v6e
topology: v6e:2x2x1
jax: 0.10.0
libtpu: 0.0.40
codegen_flags: <defaults>
</compile_context>

<pallas_src>
import functools

import jax
import jax.numpy as jnp
from jax.experimental import pallas as pl
from jax.experimental.pallas import tpu as pltpu


_VMEM_LIMIT_BYTES = 32 * 1024 * 1024      # scoped VMEM limit (safe on v5e/v6e/v7x)
_VMEM_WORKSET_BUDGET = 20 * 1024 * 1024   # ~60% of the scoped limit for the working set


def _pick_block_rows(batch, n_cls, in_dtype, out_dtype=None, block_rows=None):
    """VMEM-aware batch-tile size (multiple of 8, >=2 grid steps when B > 8)."""
    if block_rows is not None:
        tb = max(8, (int(block_rows) // 8) * 8)
        return batch if batch <= tb else tb
    if batch <= 8:
        return batch                      # single full block (always legal)
    in_b = jnp.dtype(in_dtype).itemsize
    out_b = jnp.dtype(out_dtype).itemsize if out_dtype is not None else 0
    # per-row working set: 2x double-buffered input + 2x double-buffered (TB,C)
    # scores output (eval path only) + ~4 live (TB,C) f32 temporaries
    per_row = n_cls * (2 * in_b + 2 * out_b + 4 * 4) + 64
    tb = _VMEM_WORKSET_BUDGET // per_row
    tb = max(8, min(2048, (tb // 8) * 8))
    # cap so the grid has >= 2 steps -> both v7x TensorCores get work
    half = (((batch + 1) // 2) + 7) // 8 * 8
    return max(8, min(tb, half))


def _low_precision_ok():
    """bf16 VPU/EUP elementwise is only worth it (and native) on v6/v7 chips."""
    try:
        kind = jax.devices()[0].device_kind.lower()
    except Exception:
        return False
    return ("v6" in kind) or ("v7" in kind)


# ----------------------------- eval kernel -----------------------------------
def _test_output_kernel(logits_ref, scores_ref, preds_ref, *, lowp):
    x_in = logits_ref[...]                                  # (TB, C) input dtype
    tb, c = x_in.shape
    # bf16 elementwise on v6e/v7x (no f32 copy of the tile); f32 otherwise.
    x = x_in if lowp else x_in.astype(jnp.float32)

    m = jnp.max(x, axis=1, keepdims=True)                   # (TB, 1)
    e = jnp.exp(x - m)
    s = jnp.sum(e, axis=1, keepdims=True, dtype=jnp.float32)  # f32 accumulation
    inv_s = pl.reciprocal(s, approx=True).astype(x.dtype)     # single EUP vrcp
    scores_ref[...] = (e * inv_s).astype(scores_ref.dtype)    # softmax(dim=1)

    # top-1 index (first occurrence on ties, matching torch argmax/topk order)
    col = jax.lax.broadcasted_iota(jnp.int32, (tb, c), 1)
    cand = jnp.where(x == m, col, jnp.int32(c))
    pred = jnp.min(cand, axis=1, keepdims=True)              # (TB, 1)
    preds_ref[...] = jnp.transpose(pred)                     # lane-dense (1, TB) store


def cls_test_output(logits, block_rows=None):
    B, C = logits.shape
    tb = _pick_block_rows(B, C, logits.dtype, logits.dtype, block_rows)
    nt = pl.cdiv(B, tb)
    lowp = (logits.dtype == jnp.bfloat16) and _low_precision_ok()
    scores, preds = pl.pallas_call(
        functools.partial(_test_output_kernel, lowp=lowp),
        grid=(nt,),
        out_shape=(
            jax.ShapeDtypeStruct((B, C), logits.dtype),       # HBM I/O in input dtype
            jax.ShapeDtypeStruct((nt, tb), jnp.int32),        # lane-dense preds rows
        ),
        in_specs=[pl.BlockSpec((tb, C), lambda i: (i, 0))],
        out_specs=(
            pl.BlockSpec((tb, C), lambda i: (i, 0)),
            pl.BlockSpec((1, tb), lambda i: (i, 0)),
        ),
        compiler_params=pltpu.CompilerParams(
            dimension_semantics=("parallel",),
            vmem_limit_bytes=_VMEM_LIMIT_BYTES),
    )(logits)
    preds = preds.reshape(-1)[:B]   # drop ragged-tail padding slots
    return {"preds": preds, "scores": scores}


# ---------------------------- training kernel --------------------------------
def _loss_kernel(logits_ref, targets_ref, loss_ref, correct_ref, *, batch):
    x_in = logits_ref[...]                                   # (TB, C) input dtype
    t = targets_ref[...]                                     # (TB, 1) int32
    tb, c = x_in.shape
    xf = x_in.astype(jnp.float32)

    col = jax.lax.broadcasted_iota(jnp.int32, (tb, c), 1)
    is_tgt = col == t

    # log-sum-exp fully in f32 (train-path precision)
    m = jnp.max(xf, axis=1, keepdims=True)                   # (TB, 1)
    e = jnp.exp(xf - m)
    s = jnp.sum(e, axis=1, keepdims=True)
    lse = jnp.log(s) + m

    # logit[target] via masked max in the input dtype (exact value selection)
    neg_inf = jnp.array(-jnp.inf, dtype=x_in.dtype)
    tgt_logit = jnp.max(jnp.where(is_tgt, x_in, neg_inf),
                        axis=1, keepdims=True).astype(jnp.float32)
    per_loss = lse - tgt_logit                                # per-sample CE, (TB, 1)

    # top-1 prediction (first max on ties) -> per-sample correct flag
    m_in = m.astype(x_in.dtype)                               # exact (max of stored values)
    cand = jnp.where(x_in == m_in, col, jnp.int32(c))
    pred = jnp.min(cand, axis=1, keepdims=True)
    correct = (pred == t).astype(jnp.float32)

    # zero ragged-tail rows (padded block rows can be Inf/NaN) so the padded
    # (num_tiles, TB) outputs sum cleanly in the wrapper
    row = jax.lax.broadcasted_iota(jnp.int32, (tb, 1), 0) + pl.program_id(0) * tb
    valid = row < batch
    loss_ref[...] = jnp.transpose(jnp.where(valid, per_loss, 0.0))      # (1, TB)
    correct_ref[...] = jnp.transpose(jnp.where(valid, correct, 0.0))    # (1, TB)


def cls_loss_and_acc(logits, targets, block_rows=None):
    B, C = logits.shape
    tb = _pick_block_rows(B, C, logits.dtype, None, block_rows)
    nt = pl.cdiv(B, tb)
    targets2d = targets.astype(jnp.int32).reshape(B, 1)
    per_loss, correct = pl.pallas_call(
        functools.partial(_loss_kernel, batch=B),
        grid=(nt,),
        out_shape=(
            jax.ShapeDtypeStruct((nt, tb), jnp.float32),      # lane-dense loss rows
            jax.ShapeDtypeStruct((nt, tb), jnp.float32),      # lane-dense correct rows
        ),
        in_specs=[
            pl.BlockSpec((tb, C), lambda i: (i, 0)),
            pl.BlockSpec((tb, 1), lambda i: (i, 0)),
        ],
        out_specs=(
            pl.BlockSpec((1, tb), lambda i: (i, 0)),
            pl.BlockSpec((1, tb), lambda i: (i, 0)),
        ),
        compiler_params=pltpu.CompilerParams(
            dimension_semantics=("parallel",),
            vmem_limit_bytes=_VMEM_LIMIT_BYTES),
    )(logits, targets2d)
    # Tiny reductions in the wrapper keep the grid axis parallel (v7x 2 TCs);
    # tail slots were zeroed in-kernel, so a plain sum is correct.
    loss = jnp.sum(per_loss) * (1.0 / B)
    acc = jnp.sum(correct) * (100.0 / B)
    return loss, acc


# ------------------------------ module wrapper --------------------------------
class BaseClsPostProcess:
    """JAX/Pallas port of eod BaseClsPostProcess (cls_loss = softmax CE)."""

    def __init__(self, block_rows=None):
        self.prefix = self.__class__.__name__
        self.training = False
        self.block_rows = block_rows

    def get_test_output(self, logits):
        return cls_test_output(logits, self.block_rows)

    def get_loss(self, logits, targets):
        loss, acc = cls_loss_and_acc(logits, targets, self.block_rows)
        return {
            f"{self.prefix}.loss": loss,
            f"{self.prefix}.accuracy": acc,
        }

    def forward(self, inp):
        logits = inp["logits"]
        if self.training:
            return self.get_loss(logits, inp["gt"])
        output = {}
        output.update(self.get_test_output(logits))
        return output

    __call__ = forward


# ----------------------------------- main -------------------------------------
if __name__ == "__main__":
    key = jax.random.PRNGKey(0)
    k1, k2, k3, k4 = jax.random.split(key, 4)

    # ---- case 1: small f32, single block -------------------------------------
    B, C = 8, 32
    logits = jax.random.normal(k1, (B, C), dtype=jnp.float32)
    gt = jax.random.randint(k2, (B,), 0, C, dtype=jnp.int32)

    module = BaseClsPostProcess()

    module.training = False
    out_eval = module({"logits": logits})
    jax.block_until_ready(out_eval["scores"])
    jax.block_until_ready(out_eval["preds"])

    ref_scores = jax.nn.softmax(logits, axis=1)
    ref_preds = jnp.argmax(logits, axis=1)
    assert out_eval["scores"].dtype == logits.dtype
    assert out_eval["preds"].shape == (B,)
    # approx reciprocal (EUP vrcp) -> loosen f32 tolerance from 1e-5 to 1e-3
    assert jnp.allclose(out_eval["scores"], ref_scores, atol=1e-3)
    assert jnp.array_equal(out_eval["preds"], ref_preds)

    module.training = True
    out_train = module({"logits": logits, "gt": gt})
    loss = jax.block_until_ready(out_train["BaseClsPostProcess.loss"])
    acc = jax.block_until_ready(out_train["BaseClsPostProcess.accuracy"])

    ref_loss = jnp.mean(jax.nn.logsumexp(logits, axis=1) - logits[jnp.arange(B), gt])
    ref_acc = jnp.mean((ref_preds == gt).astype(jnp.float32)) * 100.0
    assert jnp.allclose(loss, ref_loss, atol=1e-5)
    assert jnp.allclose(acc, ref_acc, atol=1e-5)

    # ---- case 2: bf16 I/O, tiled grid with ragged last tile -------------------
    B2, C2, TB2 = 40, 32, 16  # grid = 3 tiles, last tile ragged (8 valid rows)
    logits2 = jax.random.normal(k3, (B2, C2), dtype=jnp.float32).astype(jnp.bfloat16)
    gt2 = jax.random.randint(k4, (B2,), 0, C2, dtype=jnp.int32)

    module2 = BaseClsPostProcess(block_rows=TB2)

    module2.training = False
    out_eval2 = module2({"logits": logits2})
    jax.block_until_ready(out_eval2["scores"])
    x2_f32 = logits2.astype(jnp.float32)
    ref_scores2 = jax.nn.softmax(x2_f32, axis=1)
    ref_preds2 = jnp.argmax(logits2, axis=1)
    assert out_eval2["scores"].dtype == jnp.bfloat16
    assert out_eval2["preds"].shape == (B2,)
    assert jnp.allclose(out_eval2["scores"].astype(jnp.float32), ref_scores2, atol=2e-2)
    assert jnp.array_equal(out_eval2["preds"], ref_preds2)

    module2.training = True
    out_train2 = module2({"logits": logits2, "gt": gt2})
    loss2 = jax.block_until_ready(out_train2["BaseClsPostProcess.loss"])
    acc2 = jax.block_until_ready(out_train2["BaseClsPostProcess.accuracy"])
    ref_loss2 = jnp.mean(jax.nn.logsumexp(x2_f32, axis=1) - x2_f32[jnp.arange(B2), gt2])
    ref_acc2 = jnp.mean((ref_preds2 == gt2).astype(jnp.float32)) * 100.0
    assert jnp.allclose(loss2, ref_loss2, atol=1e-4)
    assert jnp.allclose(acc2, ref_acc2, atol=1e-4)

    # ---- case 3: auto tile selection, B > 8 (forces >= 2 grid steps) ----------
    B3, C3 = 40, 32
    logits3 = jax.random.normal(k3, (B3, C3), dtype=jnp.float32)
    gt3 = jax.random.randint(k4, (B3,), 0, C3, dtype=jnp.int32)
    module3 = BaseClsPostProcess()          # block_rows derived from VMEM budget
    module3.training = True
    out_train3 = module3({"logits": logits3, "gt": gt3})
    loss3 = jax.block_until_ready(out_train3["BaseClsPostProcess.loss"])
    ref_loss3 = jnp.mean(jax.nn.logsumexp(logits3, axis=1) - logits3[jnp.arange(B3), gt3])
    assert jnp.allclose(loss3, ref_loss3, atol=1e-5)

    print("KERNEL_OK")
</pallas_src>

<mosaic_0001>
module attributes {stable_mosaic.version = 11 : i64} {
  func.func @_test_output_kernel(%arg0: i32, %arg1: memref<8x32xf32, #tpu.memory_space<vmem>>, %arg2: memref<8x32xf32, #tpu.memory_space<vmem>>, %arg3: memref<1x8xi32, #tpu.memory_space<vmem>>) attributes {dimension_semantics = [#tpu.dimension_semantics<parallel>], iteration_bounds = array<i64: 1>, scalar_prefetch = 0 : i64, scratch_operands = 0 : i64, tpu.core_type = #tpu.core_type<tc>, window_params = [{transform_indices = @transform_0, window_bounds = array<i64: 8, 32>}, {transform_indices = @transform_1, window_bounds = array<i64: 8, 32>}, {transform_indices = @transform_2, window_bounds = array<i64: 1, 8>}]} {
    %c0 = arith.constant 0 : index
    %c0_0 = arith.constant 0 : index
    %0 = vector.load %arg1[%c0, %c0_0] : memref<8x32xf32, #tpu.memory_space<vmem>>, vector<8x32xf32>
    %cst = arith.constant dense<0xFF800000> : vector<8xf32>
    %1 = vector.multi_reduction <maximumf>, %0, %cst [1] : vector<8x32xf32> to vector<8xf32>
    %2 = vector.shape_cast %1 : vector<8xf32> to vector<8x1xf32>
    %3 = vector.broadcast %2 : vector<8x1xf32> to vector<8x32xf32>
    %4 = arith.subf %0, %3 : vector<8x32xf32>
    %5 = math.exp %4 : vector<8x32xf32>
    %cst_1 = arith.constant dense<0.000000e+00> : vector<8xf32>
    %6 = vector.multi_reduction <add>, %5, %cst_1 [1] : vector<8x32xf32> to vector<8xf32>
    %7 = vector.shape_cast %6 : vector<8xf32> to vector<8x1xf32>
    %8 = tpu.reciprocal %7 {approx = true} : vector<8x1xf32> -> vector<8x1xf32>
    %9 = vector.broadcast %8 : vector<8x1xf32> to vector<8x32xf32>
    %10 = arith.mulf %5, %9 : vector<8x32xf32>
    %c0_2 = arith.constant 0 : index
    %c0_3 = arith.constant 0 : index
    %11 = vector.load %arg2[%c0_2, %c0_3] : memref<8x32xf32, #tpu.memory_space<vmem>>, vector<8x32xf32>
    tpu.vector_store %arg2[%c0_2, %c0_3], %10 {strides = array<i32>} : memref<8x32xf32, #tpu.memory_space<vmem>>, vector<8x32xf32>,
    %12 = tpu.iota {dimensions = array<i32: 1>} : vector<8x32xi32>
    %13 = vector.broadcast %2 : vector<8x1xf32> to vector<8x32xf32>
    %14 = arith.cmpf oeq, %0, %13 : vector<8x32xf32>
    %c32_i32 = arith.constant 32 : i32
    %15 = vector.broadcast %c32_i32 : i32 to vector<8x32xi32>
    %16 = arith.select %14, %12, %15 : vector<8x32xi1>, vector<8x32xi32>
    %cst_4 = arith.constant dense<2147483647> : vector<8xi32>
    %17 = vector.multi_reduction <minsi>, %16, %cst_4 [1] : vector<8x32xi32> to vector<8xi32>
    %18 = vector.shape_cast %17 : vector<8xi32> to vector<8x1xi32>
    %19 = tpu.transpose %18, [1, 0] : vector<8x1xi32> -> vector<1x8xi32>
    %c0_5 = arith.constant 0 : index
    %c0_6 = arith.constant 0 : index
    %20 = vector.load %arg3[%c0_5, %c0_6] : memref<1x8xi32, #tpu.memory_space<vmem>>, vector<1x8xi32>
    tpu.vector_store %arg3[%c0_5, %c0_6], %19 {strides = array<i32>} : memref<1x8xi32, #tpu.memory_space<vmem>>, vector<1x8xi32>,
    return
  }
  func.func @transform_0(%arg0: i32) -> (i32, i32) {
    %c0_i32 = arith.constant 0 : i32
    %c0_i32_0 = arith.constant 0 : i32
    return %arg0, %c0_i32 : i32, i32
  }
  func.func @transform_1(%arg0: i32) -> (i32, i32) {
    %c0_i32 = arith.constant 0 : i32
    %c0_i32_0 = arith.constant 0 : i32
    return %arg0, %c0_i32 : i32, i32
  }
  func.func @transform_2(%arg0: i32) -> (i32, i32) {
    %c0_i32 = arith.constant 0 : i32
    %c0_i32_0 = arith.constant 0 : i32
    return %arg0, %c0_i32 : i32, i32
  }
}

</mosaic_0001>

<bundles_post_ra>
// kernel: tpu_custom_call.1
= control target key start
LH: loop header
LB: loop body
LE: loop exit
PB: predicated region body
PF: predicated region fallthrough
CT: control target
= control target key end

     0   :  { %8 = vsyncpa [#allocation3], 0  ;;  %s225_s0 = inlined_call_operand.hbm [shape: f32[8,32], index: 0, kind: input, shape index: {}]   ;;  %s226_s1 = inlined_call_operand.hbm [shape: f32[8,32], index: 1, kind: output, shape index: {0}]   ;;  %s227_s2 = inlined_call_operand.hbm [shape: s32[1,8], index: 2, kind: output, shape index: {1}]  }
   0x1   :  { %9 = vsyncpa [#allocation4], 0 }
   0x2   :  { %10 = vsyncpa [#allocation7], 0  ;;  %s194_s9 = smov [#allocation2]  }
   0x3   :  { %s17_s10 = sshll.u32 %s194_s9, 4  ;;  %s18_s10 = int_to_ptr.vmem [resolvable:$true] %s17_s10 }
   0x4   :  { %s136_s11 = scalar_lea.vmem %s18_s10, 128  ;;  %p141_p1 = scmp.lt.s32.totalorder %s18_s10, %s18_s10 }
   0x5   :  { %p137_p0 = scmp.ne.s32.totalorder %s18_s10, %s136_s11  ;;  %p142_p2 = scmp.lt.s32.totalorder %s136_s11, %s136_s11 }
   0x7   :  { %p143_p3 = por %p142_p2, %p141_p1 }
   0x9   :  { %p144_p4 = pnand %p143_p3, %p137_p0 }
   0xb   :  { %147 = shalt.err (!%p144_p4)
}
   0xc   :  { %20 = dma.hbm_to_vmem [thread:$0]  %s225_s0, 128, %s18_s10, [#allocation3]  }
   0xd   :  { %188 = dma.done.wait [#allocation3], 128  }
   0xe   :  { %189 = vsyncadd [#allocation3], 4294967168  ;;  %vm25_vm0 = vcmask 261120   ;;  %v24_v0 = vld [vmem:[#allocation2] sm:$0xff]  ;;  %v38_v2 = vlaneseq  ;;  %s195_s0 = smov [#allocation5]  }
   0xf   :  { %v26_v1 = vsel %vm25_vm0, %v24_v0, -inf  ;;  %s97_s14 = sshll.u32 %s195_s0, 4  ;;  %s98_s14 = int_to_ptr.vmem [resolvable:$true] %s97_s14 }
  0x10   :  { %27 = vmax.xlane.f32.xlu0 %v26_v1  ;;  %v39_v3 = vand.u32 127, %v38_v2  ;;  %s148_s15 = scalar_lea.vmem %s98_s14, 128  ;;  %p153_p6 = scmp.lt.s32.totalorder %s98_s14, %s98_s14 }
  0x11   :  { %p149_p5 = scmp.ne.s32.totalorder %s98_s14, %s148_s15  ;;  %p154_p7 = scmp.lt.s32.totalorder %s148_s15, %s148_s15 }
  0x13   :  { %p155_p8 = por %p154_p7, %p153_p6 }
  0x15   :  { %p156_p9 = pnand %p155_p8, %p149_p5 }
  0x99   :  { %v28_v4 = vpop.xlane.xlu0 %27 }
  0x9a   :  { %vm40_vm1 = vcmp.eq.f32.partialorder %v24_v0, %v28_v4  ;;  %v29_v9 = vsub.f32 %v24_v0, %v28_v4 }
  0x9b   :  { %v41_v5 = vsel %vm40_vm1, %v39_v3, 32 }
  0x9c   :  { %v42_v6 = vsel %vm25_vm0, %v41_v5, 2147483647  ;;  %v30_v10 = vmul.f32 1.442695, %v29_v9 }
  0x9d   :  { %v44_v7 = vshra.s32 %v42_v6, 16  ;;  %v43_v11 = vand.u32 65535, %v42_v6 }
  0x9e   :  { %124 = vpow2.f32 %v30_v10 }
  0x9f   :  { %v46_v8 = vcvt.s32.f32 %v44_v7  ;;  %v45_v13 = vcvt.s32.f32 %v43_v11 }
  0xa1   :  { %47 = vmin.xlane.f32.xlu0 %v46_v8 }
  0xab   :  { %v125_v15 = vpop.eup %124 }
  0xac   :  { %v32_v16 = vsel %vm25_vm0, %v125_v15, 0.0 }
 0x12a   :  { %v48_v12 = vpop.xlane.xlu0 %47 }
 0x12b   :  { %vm49_vm2 = vcmp.eq.f32.partialorder %v46_v8, %v48_v12  ;;  %v54_v17 = vcvt.f32.s32 %v48_v12 }
 0x12c   :  { %v50_v14 = vsel %vm49_vm2, %v45_v13, inf }
 0x12d   :  { %51 = vmin.xlane.f32.xlu1 %v50_v14  ;;  %v55_v19 = vshll.u32 %v54_v17, 16 }
 0x131   :  { %33 = vadd.xlane.f32.xlu1 %v32_v16 }
 0x1b6   :  { %v52_v18 = vpop.xlane.xlu1 %51 }
 0x1b7   :  { %v53_v20 = vcvt.f32.s32 %v52_v18 }
 0x1b9   :  { %v56_v21 = vadd.s32 %v55_v19, %v53_v20 }
 0x1ba   :  { %v34_v22 = vpop.xlane.xlu1 %33 }
 0x1bb   :  { %126 = vrcp.f32 %v34_v22  ;;  %57 = vxpose.xlu0.b32.start.end [1/1] (short) (narrow) %v56_v21, 8 }
 0x1c8   :  { %v127_v23 = vpop.eup %126 }
 0x1c9   :  { %v36_v24 = vmul.f32 %v127_v23, %v125_v15 }
 0x1cb   :  { %37 = vst.msk [vmem:[#allocation5] sm:$0xff] %vm25_vm0, %v36_v24 }
 0x1cc   :  { %159 = shalt.err (!%p156_p9)
}
 0x1cd   :  { %100 = dma.vmem_to_hbm [thread:$0]  %s98_s14, 128, %s226_s1, [#allocation4]   ;;  %vm89_vm3 = vcmask 57344  }
 0x1ce   :  { %s196_s18 = smov [#allocation6]  }
 0x1cf   :  { %s107_s19 = sshll.u32 %s196_s18, 4  ;;  %s108_s19 = int_to_ptr.vmem [resolvable:$true] %s107_s19 }
 0x1d0   :  { %s168_s20 = scalar_lea.vmem %s108_s19, 16  ;;  %s172_s21 = scalar_lea.vmem %s108_s19, 32 }
 0x1d1   :  { %p169_p10 = scmp.ne.s32.totalorder %s108_s19, %s168_s20  ;;  %p173_p11 = scmp.lt.s32.totalorder %s108_s19, %s108_s19 }
 0x1d2   :  { %p174_p12 = scmp.lt.s32.totalorder %s172_s21, %s168_s20 }
 0x1d4   :  { %p175_p13 = por %p174_p12, %p173_p11 }
 0x1d6   :  { %p176_p0 = pnand %p175_p13, %p169_p10 }
 0x237   :  { %v73_v25 = vpop.trf.xlu0 }
 0x238   :  { %90 = vst.msk [vmem:[#allocation6] sm:$0x1] %vm89_vm3, %v73_v25 }
 0x239   :  { %179 = shalt.err (!%p176_p0)
}
 0x23a   :  { %110 = dma.vmem_to_hbm [thread:$0]  %s108_s19, 16, %s227_s2, [#allocation7]  }
 0x23b   :  { %190 = dma.done.wait [#allocation4], 128  }
 0x23c   :  { %191 = vsyncadd [#allocation4], 4294967168 }
 0x23d   :  { %192 = dma.done.wait [#allocation7], 16  }
 0x23e   :  { %193 = vsyncadd [#allocation7], 4294967280 }
 0x23f   :  { %117 = vsyncpa [#allocation3], 1 }
 0x240   :  { %118 = vsyncpa [#allocation4], 1 }
 0x241   :  { %119 = vsyncpa [#allocation7], 1 }

</bundles_post_ra>
